<compile_context>
chip_gen: v6e
topology: v6e:2x2x1
jax: 0.10.0
libtpu: 0.0.40
codegen_flags: <defaults>
</compile_context>

<pallas_src>
import functools
import math

import jax
import jax.numpy as jnp
from jax import lax
from jax.experimental import pallas as pl
from jax.experimental.pallas import tpu as pltpu


def _round_up(x: int, m: int) -> int:
    return ((x + m - 1) // m) * m


def _fused_mlp_kernel(layer_meta, in_dim, precision, x_ref, w_ref, b_ref, out_ref):
    """Fused y = (...((x @ W0^T + b0) @ W1^T + b1)...), entirely in VMEM.

    w_ref : packed weight slab. Layer i lives at rows
            [row_off_i, row_off_i + kp_i), cols [0, np_i), already transposed
            to (K, N) layout and zero-padded (padded K rows / N lanes are 0).
    b_ref : packed bias slab. Layer i at row i, cols [0, np_i), zero-padded.

    The incoming activation is unpadded, so layer 0 slices only its first
    `in_dim` K rows; later layers consume the full padded K because the
    padded lanes of the previous activation and the padded K rows of the
    weight are both exactly zero (zero contribution).
    """
    h = x_ref[...]
    for li, (row_off, kp, np_) in enumerate(layer_meta):
        k_rows = in_dim if li == 0 else kp
        w = w_ref[row_off:row_off + k_rows, :np_]     # static slice -> free view
        b = b_ref[li:li + 1, :np_]                    # (1, np_)
        h = jnp.dot(h, w, preferred_element_type=jnp.float32,
                    precision=precision) + b
    out_ref[...] = h                                  # lane-dense, unmasked stores


class Transform:
    """JAX/Pallas port of the PyTorch Transform module (stack of Linears)."""

    # Above this VMEM footprint (×2 for pipelining buffers), the whole-stack-
    # in-VMEM design must be replaced with a tiled grid (see TODO above).
    # Chosen conservatively for v7x's 64 MiB/TC.
    _MAX_RESIDENT_BYTES = 40 * 1024 * 1024

    def __init__(self, config, key, precision=lax.Precision.DEFAULT):
        self.config = config
        self.precision = precision
        self.layer_dims = []   # (in_features, out_features) per Linear
        self.vars = []         # raw PyTorch-layout params: w (out,in), b (out,)
        for name, param in config:
            if name == "Linear":
                in_f, out_f = param[0], param[1]
                key, sub = jax.random.split(key)
                # kaiming_normal_ on a (out,in) tensor: fan_in=in, gain=sqrt(2)
                std = math.sqrt(2.0 / in_f)
                w = std * jax.random.normal(sub, (out_f, in_f), dtype=jnp.float32)
                b = jnp.zeros((out_f,), dtype=jnp.float32)
                self.vars.append(w)
                self.vars.append(b)
                self.layer_dims.append((in_f, out_f))
            else:
                # The reference PyTorch module also only implements 'Linear'.
                raise ValueError(f"Unsupported layer type in config: {name}")

        self.num_layers = len(self.layer_dims)
        self.in_dim = self.layer_dims[0][0]
        self.out_dim = self.layer_dims[-1][1]
        self.pad_out = _round_up(self.out_dim, 128)

        # Static packed-slab geometry (Python ints, resolved at trace time).
        meta, row, max_np = [], 0, 0
        for in_f, out_f in self.layer_dims:
            kp = _round_up(in_f, 128)
            np_ = _round_up(out_f, 128)
            meta.append((row, kp, np_))
            max_np = max(max_np, np_)
            row += kp
        self.layer_meta = tuple(meta)
        self.w_rows = row
        self.max_np = max_np

        # Pack default params ONCE (transpose + zero-pad off the hot path).
        self._w_slab, self._b_slab = self._pack(self.vars)

        self._fwd_packed = jax.jit(self._forward_packed)
        self._fwd_raw = jax.jit(self._forward_raw)

    # ---- parameter packing --------------------------------------------------
    def _pack(self, vars):
        """Pack PyTorch-layout (out,in)/(out,) params into two padded slabs."""
        if len(vars) != 2 * self.num_layers:
            raise ValueError("vars length does not match config")
        w_slab = jnp.zeros((self.w_rows, self.max_np), jnp.float32)
        b_slab = jnp.zeros((self.num_layers, self.max_np), jnp.float32)
        for li, (in_f, out_f) in enumerate(self.layer_dims):
            w = jnp.asarray(vars[2 * li], jnp.float32)
            b = jnp.asarray(vars[2 * li + 1], jnp.float32)
            if w.shape != (out_f, in_f) or b.shape != (out_f,):
                raise ValueError(
                    f"layer {li}: expected w{(out_f, in_f)}, b{(out_f,)}, "
                    f"got w{w.shape}, b{b.shape}")
            row_off = self.layer_meta[li][0]
            w_slab = w_slab.at[row_off:row_off + in_f, :out_f].set(w.T)
            b_slab = b_slab.at[li, :out_f].set(b)
        return w_slab, b_slab

    # ---- fused forward ------------------------------------------------------
    def _forward_packed(self, features, w_slab, b_slab):
        if features.shape[-1] != self.in_dim:
            raise ValueError(
                f"features last dim {features.shape[-1]} != in_dim {self.in_dim}")
        lead = features.shape[:-1]
        x = features.reshape(-1, self.in_dim).astype(jnp.float32)
        m = x.shape[0]

        # Explicit VMEM budget from the actual padded footprint (operands +
        # padded output + a couple of live intermediate activation slabs),
        # doubled for Pallas buffering.  Keeps v7x's 64 MiB/TC honest.
        bytes_needed = 4 * (x.size + w_slab.size + b_slab.size
                            + m * self.pad_out + 2 * m * self.max_np)
        if 2 * bytes_needed > self._MAX_RESIDENT_BYTES:
            # TODO(synk): tile K/N with a grid + accumulator scratch instead.
            raise ValueError("Transform stack too large for whole-in-VMEM kernel")
        vmem_limit = min(128 * 1024 * 1024,
                         max(4 * 1024 * 1024, 2 * bytes_needed + (1 << 20)))

        kernel = functools.partial(
            _fused_mlp_kernel, self.layer_meta, self.in_dim, self.precision)

        out_p = pl.pallas_call(
            kernel,
            out_shape=jax.ShapeDtypeStruct((m, self.pad_out), jnp.float32),
            in_specs=[pl.BlockSpec(memory_space=pltpu.MemorySpace.VMEM)] * 3,
            out_specs=pl.BlockSpec(memory_space=pltpu.MemorySpace.VMEM),
            compiler_params=pltpu.CompilerParams(vmem_limit_bytes=vmem_limit),
        )(x, w_slab, b_slab)

        # Kernel output stays lane-padded (unmasked stores, esp. on v5e);
        # slice back to the logical width outside, or skip if already dense.
        out = out_p if self.pad_out == self.out_dim else out_p[:, : self.out_dim]
        return out.reshape(lead + (self.out_dim,))

    def _forward_raw(self, features, vars):
        # Packing runs inside jit -> no eager per-layer dispatches.
        w_slab, b_slab = self._pack(vars)
        return self._forward_packed(features, w_slab, b_slab)

    def __call__(self, features, vars=None):
        if vars is None:
            return self._fwd_packed(features, self._w_slab, self._b_slab)
        return self._fwd_raw(features, tuple(vars))

    def parameters(self):
        return self.vars


if __name__ == "__main__":
    key = jax.random.PRNGKey(0)
    key, k_feat, k_params = jax.random.split(key, 3)

    # Small shapes implied by the forward: features (batch, in_dim), two
    # stacked Linear layers.
    config = [("Linear", (32, 64)), ("Linear", (64, 16))]
    batch = 8

    model = Transform(config, k_params)
    features = jax.random.normal(k_feat, (batch, 32), dtype=jnp.float32)

    out = jax.block_until_ready(model(features))

    # Same result must come out of the vars-override (jit-packed) path.
    out_override = jax.block_until_ready(model(features, vars=model.vars))

    # Plain-JAX f32 reference (the kernel uses DEFAULT MXU precision, so
    # compare with a bf16-rounding-sized tolerance).
    ref = features.astype(jnp.float32)
    idx = 0
    for name, param in config:
        if name == "Linear":
            w, b = model.vars[idx], model.vars[idx + 1]
            ref = jnp.dot(ref, w.T, precision=lax.Precision.HIGHEST) + b
            idx += 2

    assert out.shape == (batch, config[-1][1][1])
    assert jnp.allclose(out, ref, atol=5e-2, rtol=5e-2)
    assert jnp.allclose(out, out_override, atol=1e-6, rtol=1e-6)

    print("KERNEL_OK")
</pallas_src>

<mosaic_0001>
module attributes {stable_mosaic.version = 11 : i64} {
  func.func @_fused_mlp_kernel(%arg0: memref<8x32xf32, #tpu.memory_space<vmem>>, %arg1: memref<256x128xf32, #tpu.memory_space<vmem>>, %arg2: memref<2x128xf32, #tpu.memory_space<vmem>>, %arg3: memref<8x128xf32, #tpu.memory_space<vmem>>) attributes {dimension_semantics = [], scalar_prefetch = 0 : i64, scratch_operands = 0 : i64, tpu.core_type = #tpu.core_type<tc>} {
    %c0 = arith.constant 0 : index
    %c0_0 = arith.constant 0 : index
    %0 = vector.load %arg0[%c0, %c0_0] : memref<8x32xf32, #tpu.memory_space<vmem>>, vector<8x32xf32>
    %c0_1 = arith.constant 0 : index
    %c0_2 = arith.constant 0 : index
    %1 = vector.load %arg1[%c0_1, %c0_2] : memref<256x128xf32, #tpu.memory_space<vmem>>, vector<32x128xf32>
    %c0_3 = arith.constant 0 : index
    %c0_4 = arith.constant 0 : index
    %2 = vector.load %arg2[%c0_3, %c0_4] : memref<2x128xf32, #tpu.memory_space<vmem>>, vector<1x128xf32>
    %cst = arith.constant dense<0.000000e+00> : vector<8x128xf32>
    %3 = tpu.matmul %0, %1, %cst {dimension_numbers = #tpu.dot_dimension_numbers<[1], [0], [0], [1], [0, 0, 1, 1], [], []>} : vector<8x32xf32>, vector<32x128xf32>, vector<8x128xf32> -> vector<8x128xf32>
    %4 = vector.broadcast %2 : vector<1x128xf32> to vector<8x128xf32>
    %5 = arith.addf %3, %4 : vector<8x128xf32>
    %c128 = arith.constant 128 : index
    %c0_5 = arith.constant 0 : index
    %6 = vector.load %arg1[%c128, %c0_5] : memref<256x128xf32, #tpu.memory_space<vmem>>, vector<128x128xf32>
    %c1 = arith.constant 1 : index
    %c0_6 = arith.constant 0 : index
    %7 = vector.load %arg2[%c1, %c0_6] : memref<2x128xf32, #tpu.memory_space<vmem>>, vector<1x128xf32>
    %cst_7 = arith.constant dense<0.000000e+00> : vector<8x128xf32>
    %8 = tpu.matmul %5, %6, %cst_7 {dimension_numbers = #tpu.dot_dimension_numbers<[1], [0], [0], [1], [0, 0, 1, 1], [], []>} : vector<8x128xf32>, vector<128x128xf32>, vector<8x128xf32> -> vector<8x128xf32>
    %9 = vector.broadcast %7 : vector<1x128xf32> to vector<8x128xf32>
    %10 = arith.addf %8, %9 : vector<8x128xf32>
    %c0_8 = arith.constant 0 : index
    %c0_9 = arith.constant 0 : index
    %11 = vector.load %arg3[%c0_8, %c0_9] : memref<8x128xf32, #tpu.memory_space<vmem>>, vector<8x128xf32>
    tpu.vector_store %arg3[%c0_8, %c0_9], %10 {strides = array<i32>} : memref<8x128xf32, #tpu.memory_space<vmem>>, vector<8x128xf32>,
    return
  }
}

</mosaic_0001>

<bundles_post_ra>
// kernel: _forward_packed.1
= control target key start
LH: loop header
LB: loop body
LE: loop exit
PB: predicated region body
PF: predicated region fallthrough
CT: control target
= control target key end

     0   :  { %8 = vsyncpa [#allocation3], 0  ;;  %s441_s0 = inlined_call_operand.hbm [shape: f32[8,32], index: 0, kind: input, shape index: {}]   ;;  %s442_s1 = inlined_call_operand.hbm [shape: f32[256,128], index: 1, kind: input, shape index: {}]   ;;  %s443_s2 = inlined_call_operand.vmem [shape: f32[2,128], index: 2, kind: input, shape index: {}]   ;;  %s444_s3 = inlined_call_operand.hbm [shape: f32[8,128], index: 3, kind: output, shape index: {}]  }
   0x1   :  { %9 = vsyncpa [#allocation6], 0 }
   0x2   :  { %10 = vsyncpa [#allocation4], 0  ;;  %s377_s12 = smov [#allocation2]   ;;  %s378_s14 = smov [#allocation5]  }
   0x3   :  { %s17_s13 = sshll.u32 %s377_s12, 4  ;;  %s26_s15 = sshll.u32 %s378_s14, 4  ;;  %s18_s13 = int_to_ptr.vmem [resolvable:$true] %s17_s13  ;;  %s27_s15 = int_to_ptr.vmem [resolvable:$true] %s26_s15 }
   0x4   :  { %s319_s16 = scalar_lea.vmem %s18_s13, 128  ;;  %p324_p1 = scmp.lt.s32.totalorder %s18_s13, %s18_s13 }
   0x5   :  { %p320_p0 = scmp.ne.s32.totalorder %s18_s13, %s319_s16  ;;  %p325_p2 = scmp.lt.s32.totalorder %s319_s16, %s319_s16 }
   0x7   :  { %p326_p3 = por %p325_p2, %p324_p1 }
   0x9   :  { %p327_p4 = pnand %p326_p3, %p320_p0 }
   0xb   :  { %330 = shalt.err (!%p327_p4)
}
   0xc   :  { %20 = dma.hbm_to_vmem [thread:$0]  %s441_s0, 128, %s18_s13, [#allocation3]  }
   0xd   :  { %s339_s19 = scalar_lea.vmem %s27_s15, 4096  ;;  %p344_p6 = scmp.lt.s32.totalorder %s27_s15, %s27_s15 }
   0xe   :  { %p340_p5 = scmp.ne.s32.totalorder %s27_s15, %s339_s19  ;;  %p345_p7 = scmp.lt.s32.totalorder %s339_s19, %s339_s19 }
  0x10   :  { %p346_p8 = por %p345_p7, %p344_p6 }
  0x12   :  { %p347_p9 = pnand %p346_p8, %p340_p5 }
  0x14   :  { %350 = shalt.err (!%p347_p9)
}
  0x15   :  { %s379_s20 = smov 128   ;;  %s380_s21 = smov 8  }
  0x16   :  { %32 = dma.hbm_to_vmem [thread:$0]  %s442_s1, 4096, %s27_s15, [#allocation6], %s379_s20, %s379_s20, %s380_s21  }
  0x17   :  { %371 = dma.done.wait [#allocation3], 128  }
  0x18   :  { %372 = vsyncadd [#allocation3], 4294967168 }
  0x19   :  { %373 = dma.done.wait [#allocation6], 4096  }
  0x1a   :  { %374 = vsyncadd [#allocation6], 4294963200  ;;  %v381_v0 = vmov 0.0   ;;  %vm382_vm0 = vmmov 0   ;;  %v45_v1 = vld [vmem:[#allocation5 + $0x18] sm:$0xff]  ;;  %v44_v2 = vld [vmem:[#allocation5 + $0x10] sm:$0xff] }
  0x1b   :  { %258 = vmatprep.subr.mxu0 %v381_v0  ;;  %266 = vmatprep.mubr.msk.f32.mxu0 %vm382_vm0, %v381_v0  ;;  %v140_v3 = vld [vmem:[#allocation5 + $0xf8] sm:$0xff]  ;;  %v43_v4 = vld [vmem:[#allocation5 + $0x8] sm:$0xff]  ;;  %v139_v5 = vld [vmem:[#allocation5 + $0xf0] sm:$0xff]  ;;  %vm51_vm1 = vcmask 261120   ;;  %s383_s26 = smov [#allocation7]  }
  0x1c   :  { %269 = vmatprep.subr.mxu1 %v381_v0  ;;  %301 = vmatprep.mubr.msk.f32.mxu1 %vm382_vm0, %v381_v0  ;;  %v138_v6 = vld [vmem:[#allocation5 + $0xe8] sm:$0xff]  ;;  %v42_v7 = vld [vmem:[#allocation5] sm:$0xff]  ;;  %v41_v8 = vld [vmem:[#allocation2] sm:$0xff]  ;;  %s223_s27 = sshll.u32 %s383_s26, 4  ;;  %s224_s27 = int_to_ptr.vmem [resolvable:$true] %s223_s27 }
  0x1d   :  { %259 = vmatpush3.msra.mxu0 %v45_v1  ;;  %270 = vmatpush3.msra.mxu1 %v140_v3  ;;  %v137_v9 = vld [vmem:[#allocation5 + $0xe0] sm:$0xff]  ;;  %v136_v10 = vld [vmem:[#allocation5 + $0xd8] sm:$0xff]  ;;  %v135_v11 = vld [vmem:[#allocation5 + $0xd0] sm:$0xff]  ;;  %s351_s28 = scalar_lea.vmem %s224_s27, 128  ;;  %p356_p11 = scmp.lt.s32.totalorder %s224_s27, %s224_s27 }
  0x1e   :  { %260 = vmatprep.subr.mxu0 %v381_v0  ;;  %271 = vmatprep.subr.mxu1 %v381_v0  ;;  %v134_v12 = vld [vmem:[#allocation5 + $0xc8] sm:$0xff]  ;;  %v133_v13 = vld [vmem:[#allocation5 + $0xc0] sm:$0xff]  ;;  %v132_v14 = vld [vmem:[#allocation5 + $0xb8] sm:$0xff]  ;;  %p352_p10 = scmp.ne.s32.totalorder %s224_s27, %s351_s28  ;;  %p357_p12 = scmp.lt.s32.totalorder %s351_s28, %s351_s28 }
  0x1f   :  { %261 = vmatpush3.msra.mxu0 %v44_v2  ;;  %272 = vmatpush3.msra.mxu1 %v139_v5  ;;  %v131_v15 = vld [vmem:[#allocation5 + $0xb0] sm:$0xff]  ;;  %v130_v16 = vld [vmem:[#allocation5 + $0xa8] sm:$0xff]  ;;  %v129_v17 = vld [vmem:[#allocation5 + $0xa0] sm:$0xff] }
  0x20   :  { %262 = vmatprep.subr.mxu0 %v381_v0  ;;  %273 = vmatprep.subr.mxu1 %v381_v0  ;;  %v128_v18 = vld [vmem:[#allocation5 + $0x98] sm:$0xff]  ;;  %v127_v19 = vld [vmem:[#allocation5 + $0x90] sm:$0xff]  ;;  %v126_v20 = vld [vmem:[#allocation5 + $0x88] sm:$0xff]  ;;  %p358_p13 = por %p357_p12, %p356_p11 }
  0x21   :  { %263 = vmatpush3.msra.mxu0 %v43_v4  ;;  %274 = vmatpush3.msra.mxu1 %v138_v6  ;;  %v125_v21 = vld [vmem:[#allocation5 + $0x80] sm:$0xff]  ;;  %v233_v22 = vld [vmem:[%s443_s2] ss:$0 sm:$0xff]  ;;  %v235_v26 = vld [vmem:[%s443_s2 + $0x1] ss:$0 sm:$0xff] }
  0x22   :  { %264 = vmatprep.subr.mxu0 %v381_v0  ;;  %275 = vmatprep.subr.mxu1 %v381_v0  ;;  %p359_p0 = pnand %p358_p13, %p352_p10 }
  0x23   :  { %265 = vmatpush3.msra.mxu0 %v42_v7  ;;  %276 = vmatpush3.msra.mxu1 %v137_v9 }
  0x24   :  { %267 = vmatmul.mubr.msk.f32.vlgmr.msra.gmra.mxu0 %vm51_vm1, %v41_v8  ;;  %277 = vmatprep.subr.mxu1 %v381_v0 }
  0x25   :  { %278 = vmatpush3.msra.mxu1 %v136_v10 }
  0x26   :  { %279 = vmatprep.subr.mxu1 %v381_v0 }
  0x27   :  { %280 = vmatpush3.msra.mxu1 %v135_v11 }
  0x28   :  { %281 = vmatprep.subr.mxu1 %v381_v0 }
  0x29   :  { %282 = vmatpush3.msra.mxu1 %v134_v12 }
  0x2a   :  { %283 = vmatprep.subr.mxu1 %v381_v0 }
  0x2b   :  { %284 = vmatpush3.msra.mxu1 %v133_v13 }
  0x2c   :  { %285 = vmatprep.subr.mxu1 %v381_v0 }
  0x2d   :  { %286 = vmatpush3.msra.mxu1 %v132_v14 }
  0x2e   :  { %287 = vmatprep.subr.mxu1 %v381_v0 }
  0x2f   :  { %288 = vmatpush3.msra.mxu1 %v131_v15 }
  0x30   :  { %289 = vmatprep.subr.mxu1 %v381_v0 }
  0x31   :  { %290 = vmatpush3.msra.mxu1 %v130_v16 }
  0x32   :  { %291 = vmatprep.subr.mxu1 %v381_v0 }
  0x33   :  { %292 = vmatpush3.msra.mxu1 %v129_v17 }
  0x34   :  { %293 = vmatprep.subr.mxu1 %v381_v0 }
  0x35   :  { %294 = vmatpush3.msra.mxu1 %v128_v18 }
  0x36   :  { %295 = vmatprep.subr.mxu1 %v381_v0 }
  0x37   :  { %296 = vmatpush3.msra.mxu1 %v127_v19 }
  0x38   :  { %297 = vmatprep.subr.mxu1 %v381_v0 }
  0x39   :  { %298 = vmatpush3.msra.mxu1 %v126_v20 }
  0x3a   :  { %299 = vmatprep.subr.mxu1 %v381_v0 }
  0x3b   :  { %300 = vmatpush3.msra.mxu1 %v125_v21 }
  0xe4   :  { %v121_v23 = vpop.f32.mrf.mxu0 }
  0xe5   :  { %v122_v24 = vadd.f32 %v233_v22, %v121_v23 }
  0xe6   :  { %v268_v25 = vpop.f32.mrf.mxu0 }
  0xe7   :  { %302 = vmatmul.mubr.f32.vlgmr.msra.gmra.mxu1 %v122_v24 }
 0x1a7   :  { %v212_v27 = vpop.f32.mrf.mxu1 }
 0x1a8   :  { %v213_v28 = vadd.f32 %v235_v26, %v212_v27 }
 0x1a9   :  { %v303_v29 = vpop.f32.mrf.mxu1 }
 0x1aa   :  { %216 = vst [vmem:[#allocation7] sm:$0xff] %v213_v28 }
 0x1ab   :  { %362 = shalt.err (!%p359_p0)
}
 0x1ac   :  { %226 = dma.vmem_to_hbm [thread:$0]  %s224_s27, 128, %s444_s3, [#allocation4]  }
 0x1ad   :  { %375 = dma.done.wait [#allocation4], 128  }
 0x1ae   :  { %376 = vsyncadd [#allocation4], 4294967168 }
 0x1af   :  { %230 = vsyncpa [#allocation3], 1 }
 0x1b0   :  { %231 = vsyncpa [#allocation6], 1 }
 0x1b1   :  { %232 = vsyncpa [#allocation4], 1 }

</bundles_post_ra>
